<compile_context>
chip_gen: v7x
topology: tpu7x:2x2x1
jax: 0.10.0
libtpu: 0.0.40
codegen_flags: <defaults>
</compile_context>

<pallas_src>
import jax
import jax.numpy as jnp
from jax.experimental import pallas as pl
from jax.experimental.pallas import tpu as pltpu  # noqa: F401  (kept for parity with TPU-kernel conventions)

LANE = 128  # TPU lane width; all feature dims are padded to this.


def mlp_kernel(x_ref, w1_ref, b1_ref, w2_ref, b2_ref, w3_ref, b3_ref, o_ref):
    # hidden_layer_1 + ReLU  (bf16 matmul inputs, f32 accumulate, f32 elementwise)
    h1 = jnp.dot(x_ref[...], w1_ref[...], preferred_element_type=jnp.float32)
    h1 = jnp.maximum(h1 + b1_ref[...], 0.0)
    # hidden_layer_2 + ReLU
    h2 = jnp.dot(h1.astype(jnp.bfloat16), w2_ref[...], preferred_element_type=jnp.float32)
    h2 = jnp.maximum(h2 + b2_ref[...], 0.0)
    # output_layer (no activation, matches the PyTorch forward)
    out = jnp.dot(h2.astype(jnp.bfloat16), w3_ref[...], preferred_element_type=jnp.float32)
    o_ref[...] = (out + b3_ref[...]).astype(o_ref.dtype)


def _pad2(a, rows, cols):
    return jnp.pad(a, ((0, rows - a.shape[0]), (0, cols - a.shape[1])))


def net_forward(x, params, n_output):
    """x: (B, n_input) f32.  params: (w1,b1,w2,b2,w3,b3) with weights stored (in, out)."""
    w1, b1, w2, b2, w3, b3 = params
    B = x.shape[0]
    B_pad = ((B + 255) // 256) * 256  # fill MXU M dim, amortize launch overhead

    # Lane-dense, zero-padded operands (bf16 for the MXU inputs).
    xp = _pad2(x, B_pad, LANE).astype(jnp.bfloat16)
    w1p = _pad2(w1, LANE, LANE).astype(jnp.bfloat16)
    w2p = _pad2(w2, LANE, LANE).astype(jnp.bfloat16)
    w3p = _pad2(w3, LANE, LANE).astype(jnp.bfloat16)
    # Biases: zero-pad lanes and pre-broadcast over the padded batch (f32), so the
    # kernel adds same-shape tensors with no in-kernel sublane broadcast.
    b1p = jnp.broadcast_to(_pad2(b1, 1, LANE), (B_pad, LANE)).astype(jnp.float32)
    b2p = jnp.broadcast_to(_pad2(b2, 1, LANE), (B_pad, LANE)).astype(jnp.float32)
    b3p = jnp.broadcast_to(_pad2(b3, 1, LANE), (B_pad, LANE)).astype(jnp.float32)

    full = lambda a: pl.BlockSpec(a.shape, lambda: (0,) * a.ndim)

    out_pad = pl.pallas_call(
        mlp_kernel,
        out_shape=jax.ShapeDtypeStruct((B_pad, LANE), jnp.float32),
        grid=(),
        in_specs=[full(xp), full(w1p), full(b1p), full(w2p), full(b2p), full(w3p), full(b3p)],
        out_specs=pl.BlockSpec((B_pad, LANE), lambda: (0, 0)),
    )(xp, w1p, b1p, w2p, b2p, w3p, b3p)

    return out_pad[:B, :n_output]


def init_params(key, n_input, n_hidden_1, n_hidden_2, n_output):
    # PyTorch nn.Linear default init: U(-1/sqrt(fan_in), 1/sqrt(fan_in)); weights stored
    # here as (in, out) so the kernel does x @ W.
    ks = jax.random.split(key, 6)

    def lin(kw, kb, fan_in, fan_out):
        bound = 1.0 / jnp.sqrt(fan_in)
        w = jax.random.uniform(kw, (fan_in, fan_out), jnp.float32, -bound, bound)
        b = jax.random.uniform(kb, (1, fan_out), jnp.float32, -bound, bound)
        return w, b

    w1, b1 = lin(ks[0], ks[1], n_input, n_hidden_1)
    w2, b2 = lin(ks[2], ks[3], n_hidden_1, n_hidden_2)
    w3, b3 = lin(ks[4], ks[5], n_hidden_2, n_output)
    return (w1, b1, w2, b2, w3, b3)


def ref_forward_bf16(x, params):
    """Pure-JAX reference with the same bf16-input / f32-accumulate matmuls."""
    w1, b1, w2, b2, w3, b3 = params
    bf = jnp.bfloat16
    h1 = jnp.dot(x.astype(bf), w1.astype(bf), preferred_element_type=jnp.float32) + b1
    h1 = jnp.maximum(h1, 0.0)
    h2 = jnp.dot(h1.astype(bf), w2.astype(bf), preferred_element_type=jnp.float32) + b2
    h2 = jnp.maximum(h2, 0.0)
    return jnp.dot(h2.astype(bf), w3.astype(bf), preferred_element_type=jnp.float32) + b3


if __name__ == "__main__":
    key = jax.random.PRNGKey(0)
    k_data, k_params = jax.random.split(key)

    # Mirror the script's synthetic data: two 2-D Gaussian blobs around +2 and -2.
    n_per_class = 100
    n_input, n_hidden_1, n_hidden_2, n_output = 2, 10, 10, 2
    k0, k1 = jax.random.split(k_data)
    x0 = 2.0 + jax.random.normal(k0, (n_per_class, n_input), jnp.float32)
    x1 = -2.0 + jax.random.normal(k1, (n_per_class, n_input), jnp.float32)
    x = jnp.concatenate([x0, x1], axis=0)  # (200, 2) float32

    params = init_params(k_params, n_input, n_hidden_1, n_hidden_2, n_output)

    out = net_forward(x, params, n_output)
    jax.block_until_ready(out)

    # Sanity check against a plain-JAX reference using identical precision.
    ref = ref_forward_bf16(x, params)
    assert out.shape == (2 * n_per_class, n_output)
    assert jnp.allclose(out, ref, atol=1e-4, rtol=1e-4), float(jnp.max(jnp.abs(out - ref)))

    print("KERNEL_OK")
</pallas_src>

<mosaic_0001>
module attributes {stable_mosaic.version = 11 : i64} {
  func.func @mlp_kernel(%arg0: memref<256x128xbf16, #tpu.memory_space<vmem>>, %arg1: memref<128x128xbf16, #tpu.memory_space<vmem>>, %arg2: memref<256x128xf32, #tpu.memory_space<vmem>>, %arg3: memref<128x128xbf16, #tpu.memory_space<vmem>>, %arg4: memref<256x128xf32, #tpu.memory_space<vmem>>, %arg5: memref<128x128xbf16, #tpu.memory_space<vmem>>, %arg6: memref<256x128xf32, #tpu.memory_space<vmem>>, %arg7: memref<256x128xf32, #tpu.memory_space<vmem>>) attributes {dimension_semantics = [], scalar_prefetch = 0 : i64, scratch_operands = 0 : i64, tpu.core_type = #tpu.core_type<tc>} {
    %c0 = arith.constant 0 : index
    %c0_0 = arith.constant 0 : index
    %0 = vector.load %arg0[%c0, %c0_0] : memref<256x128xbf16, #tpu.memory_space<vmem>>, vector<256x128xbf16>
    %c0_1 = arith.constant 0 : index
    %c0_2 = arith.constant 0 : index
    %1 = vector.load %arg1[%c0_1, %c0_2] : memref<128x128xbf16, #tpu.memory_space<vmem>>, vector<128x128xbf16>
    %cst = arith.constant dense<0.000000e+00> : vector<256x128xf32>
    %2 = tpu.matmul %0, %1, %cst {dimension_numbers = #tpu.dot_dimension_numbers<[1], [0], [0], [1], [0, 0, 1, 1], [], []>} : vector<256x128xbf16>, vector<128x128xbf16>, vector<256x128xf32> -> vector<256x128xf32>
    %c0_3 = arith.constant 0 : index
    %c0_4 = arith.constant 0 : index
    %3 = vector.load %arg2[%c0_3, %c0_4] : memref<256x128xf32, #tpu.memory_space<vmem>>, vector<256x128xf32>
    %4 = arith.addf %2, %3 : vector<256x128xf32>
    %cst_5 = arith.constant 0.000000e+00 : f32
    %5 = vector.broadcast %cst_5 : f32 to vector<256x128xf32>
    %6 = arith.maximumf %4, %5 : vector<256x128xf32>
    %7 = arith.truncf %6 : vector<256x128xf32> to vector<256x128xbf16>
    %c0_6 = arith.constant 0 : index
    %c0_7 = arith.constant 0 : index
    %8 = vector.load %arg3[%c0_6, %c0_7] : memref<128x128xbf16, #tpu.memory_space<vmem>>, vector<128x128xbf16>
    %cst_8 = arith.constant dense<0.000000e+00> : vector<256x128xf32>
    %9 = tpu.matmul %7, %8, %cst_8 {dimension_numbers = #tpu.dot_dimension_numbers<[1], [0], [0], [1], [0, 0, 1, 1], [], []>} : vector<256x128xbf16>, vector<128x128xbf16>, vector<256x128xf32> -> vector<256x128xf32>
    %c0_9 = arith.constant 0 : index
    %c0_10 = arith.constant 0 : index
    %10 = vector.load %arg4[%c0_9, %c0_10] : memref<256x128xf32, #tpu.memory_space<vmem>>, vector<256x128xf32>
    %11 = arith.addf %9, %10 : vector<256x128xf32>
    %cst_11 = arith.constant 0.000000e+00 : f32
    %12 = vector.broadcast %cst_11 : f32 to vector<256x128xf32>
    %13 = arith.maximumf %11, %12 : vector<256x128xf32>
    %14 = arith.truncf %13 : vector<256x128xf32> to vector<256x128xbf16>
    %c0_12 = arith.constant 0 : index
    %c0_13 = arith.constant 0 : index
    %15 = vector.load %arg5[%c0_12, %c0_13] : memref<128x128xbf16, #tpu.memory_space<vmem>>, vector<128x128xbf16>
    %cst_14 = arith.constant dense<0.000000e+00> : vector<256x128xf32>
    %16 = tpu.matmul %14, %15, %cst_14 {dimension_numbers = #tpu.dot_dimension_numbers<[1], [0], [0], [1], [0, 0, 1, 1], [], []>} : vector<256x128xbf16>, vector<128x128xbf16>, vector<256x128xf32> -> vector<256x128xf32>
    %c0_15 = arith.constant 0 : index
    %c0_16 = arith.constant 0 : index
    %17 = vector.load %arg6[%c0_15, %c0_16] : memref<256x128xf32, #tpu.memory_space<vmem>>, vector<256x128xf32>
    %18 = arith.addf %16, %17 : vector<256x128xf32>
    %c0_17 = arith.constant 0 : index
    %c0_18 = arith.constant 0 : index
    %19 = vector.load %arg7[%c0_17, %c0_18] : memref<256x128xf32, #tpu.memory_space<vmem>>, vector<256x128xf32>
    tpu.vector_store %arg7[%c0_17, %c0_18], %18 {strides = array<i32>} : memref<256x128xf32, #tpu.memory_space<vmem>>, vector<256x128xf32>,
    return
  }
}

</mosaic_0001>

<bundles_post_ra>
// kernel: tpu_custom_call.1
= control target key start
LH: loop header
LB: loop body
LE: loop exit
PB: predicated region body
PF: predicated region fallthrough
CT: control target
= control target key end

     0   :  { %12 = vsyncpa [#allocation3], 0  ;;  %s1878_s0 = inlined_call_operand.hbm [shape: bf16[256,128], index: 0, kind: input, shape index: {}]   ;;  %s1879_s1 = inlined_call_operand.hbm [shape: bf16[128,128], index: 1, kind: input, shape index: {}]   ;;  %s1880_s2 = inlined_call_operand.hbm [shape: f32[256,128], index: 2, kind: input, shape index: {}]   ;;  %s1881_s3 = inlined_call_operand.hbm [shape: bf16[128,128], index: 3, kind: input, shape index: {}]   ;;  %s1882_s4 = inlined_call_operand.hbm [shape: f32[256,128], index: 4, kind: input, shape index: {}]   ;;  %s1883_s5 = inlined_call_operand.hbm [shape: bf16[128,128], index: 5, kind: input, shape index: {}]   ;;  %s1884_s6 = inlined_call_operand.hbm [shape: f32[256,128], index: 6, kind: input, shape index: {}]   ;;  %s1885_s7 = inlined_call_operand.hbm [shape: f32[256,128], index: 7, kind: output, shape index: {}]  }
   0x1   :  { %13 = vsyncpa [#allocation6], 0 }
   0x2   :  { %14 = vsyncpa [#allocation9], 0 }
   0x3   :  { %15 = vsyncpa [#allocation12], 0 }
   0x4   :  { %16 = vsyncpa [#allocation4], 0  ;;  %s1680_s24 = smov [#allocation5]   ;;  %s1681_s26 = smov [#allocation8]  }
   0x5   :  { %s34_s25 = sshll.u32 %s1680_s24, 4  ;;  %s58_s27 = sshll.u32 %s1681_s26, 4  ;;  %s35_s25 = int_to_ptr.vmem [resolvable:$true] %s34_s25  ;;  %s1732_s27 = int_to_ptr.vmem [resolvable:$true] %s58_s27 }
   0x6   :  { %s1494_s30 = scalar_lea.hbm %s1879_s1, 1024 }
   0x7   :  { %p1495_p0 = scmp.ne.s32.totalorder %s1879_s1, %s1494_s30  ;;  %p1498_p1 = scmp.lt.u32.totalorder %s1494_s30, %s1879_s1 }
   0x9   :  { %p1500_p2 = pnand %p1498_p1, %p1495_p0 }
   0xb   :  { %1503 = shalt.err (!%p1500_p2)
}
   0xc   :  { %s1504_s12 = scalar_lea.vmem %s35_s25, 1024  ;;  %p1509_p4 = scmp.lt.s32.totalorder %s35_s25, %s35_s25 }
   0xd   :  { %p1505_p3 = scmp.ne.s32.totalorder %s35_s25, %s1504_s12  ;;  %p1510_p5 = scmp.lt.s32.totalorder %s1504_s12, %s1504_s12 }
   0xf   :  { %p1511_p6 = por %p1510_p5, %p1509_p4 }
  0x11   :  { %p1512_p7 = pnand %p1511_p6, %p1505_p3 }
  0x13   :  { %1515 = shalt.err (!%p1512_p7)
}
  0x14   :  { %s1682_s13 = smov 64   ;;  %s1683_s14 = smov 4  }
  0x15   :  { %40 = dma.hbm_to_vmem [thread:$0]  %s1879_s1, 1024, %s35_s25, [#allocation6], %s1682_s13, %s1682_s13, %s1683_s14  }
  0x16   :  { %s1516_s19 = scalar_lea.hbm %s1881_s3, 1024 }
  0x17   :  { %p1517_p8 = scmp.ne.s32.totalorder %s1881_s3, %s1516_s19  ;;  %p1520_p9 = scmp.lt.u32.totalorder %s1516_s19, %s1881_s3 }
  0x19   :  { %p1522_p10 = pnand %p1520_p9, %p1517_p8 }
  0x1b   :  { %1525 = shalt.err (!%p1522_p10)
}
  0x1c   :  { %s1526_s24 = scalar_lea.vmem %s1732_s27, 1024  ;;  %p1531_p12 = scmp.lt.s32.totalorder %s1732_s27, %s1732_s27 }
  0x1d   :  { %p1527_p11 = scmp.ne.s32.totalorder %s1732_s27, %s1526_s24  ;;  %p1532_p13 = scmp.lt.s32.totalorder %s1526_s24, %s1526_s24 }
  0x1f   :  { %p1533_p0 = por %p1532_p13, %p1531_p12 }
  0x21   :  { %p1534_p1 = pnand %p1533_p0, %p1527_p11 }
  0x23   :  { %1537 = shalt.err (!%p1534_p1)
}
  0x24   :  { %64 = dma.hbm_to_vmem [thread:$0]  %s1881_s3, 1024, %s1732_s27, [#allocation9], %s1682_s13, %s1682_s13, %s1683_s14  }
  0x25   :  { %s1684_s26 = smov [#allocation11]   ;;  %s1685_s29 = smov [#allocation2]  }
  0x26   :  { %s82_s28 = sshll.u32 %s1684_s26, 4  ;;  %s22_s30 = sshll.u32 %s1685_s29, 4  ;;  %s83_s28 = int_to_ptr.vmem [resolvable:$true] %s82_s28  ;;  %s1769_s30 = int_to_ptr.vmem [resolvable:$true] %s22_s30 }
  0x27   :  { %s1538_s10 = scalar_lea.hbm %s1883_s5, 1024 }
  0x28   :  { %p1539_p2 = scmp.ne.s32.totalorder %s1883_s5, %s1538_s10  ;;  %p1542_p3 = scmp.lt.u32.totalorder %s1538_s10, %s1883_s5 }
  0x2a   :  { %p1544_p4 = pnand %p1542_p3, %p1539_p2 }
  0x2c   :  { %1547 = shalt.err (!%p1544_p4)
}
  0x2d   :  { %s1548_s3 = scalar_lea.vmem %s83_s28, 1024  ;;  %p1553_p6 = scmp.lt.s32.totalorder %s83_s28, %s83_s28 }
  0x2e   :  { %p1549_p5 = scmp.ne.s32.totalorder %s83_s28, %s1548_s3  ;;  %p1554_p7 = scmp.lt.s32.totalorder %s1548_s3, %s1548_s3 }
  0x30   :  { %p1555_p8 = por %p1554_p7, %p1553_p6 }
  0x32   :  { %p1556_p9 = pnand %p1555_p8, %p1549_p5 }
  0x34   :  { %1559 = shalt.err (!%p1556_p9)
}
  0x35   :  { %88 = dma.hbm_to_vmem [thread:$0]  %s1883_s5, 1024, %s83_s28, [#allocation12], %s1682_s13, %s1682_s13, %s1683_s14  }
  0x36   :  { %s1560_s20 = scalar_lea.hbm %s1878_s0, 2048 }
  0x37   :  { %p1561_p10 = scmp.ne.s32.totalorder %s1878_s0, %s1560_s20  ;;  %p1564_p11 = scmp.lt.u32.totalorder %s1560_s20, %s1878_s0 }
  0x39   :  { %p1566_p12 = pnand %p1564_p11, %p1561_p10 }
  0x3b   :  { %1569 = shalt.err (!%p1566_p12)
}
  0x3c   :  { %s1570_s1 = scalar_lea.vmem %s1769_s30, 2048  ;;  %p1575_p0 = scmp.lt.s32.totalorder %s1769_s30, %s1769_s30 }
  0x3d   :  { %p1571_p13 = scmp.ne.s32.totalorder %s1769_s30, %s1570_s1  ;;  %p1576_p1 = scmp.lt.s32.totalorder %s1570_s1, %s1570_s1 }
  0x3f   :  { %p1577_p2 = por %p1576_p1, %p1575_p0 }
  0x41   :  { %p1578_p3 = pnand %p1577_p2, %p1571_p13 }
  0x43   :  { %1581 = shalt.err (!%p1578_p3)
}
  0x44   :  { %28 = dma.hbm_to_vmem [thread:$0]  %s1878_s0, 2048, %s1769_s30, [#allocation3], %s1682_s13, %s1682_s13, %s1683_s14  }
  0x45   :  { %s1686_s26 = smov [#allocation7]   ;;  %s1582_s9 = scalar_lea.hbm %s1880_s2, 4096 }
  0x46   :  { %s46_s28 = sshll.u32 %s1686_s26, 4  ;;  %p1583_p4 = scmp.ne.s32.totalorder %s1880_s2, %s1582_s9  ;;  %s47_s28 = int_to_ptr.vmem [resolvable:$true] %s46_s28 }
  0x47   :  { %p1586_p5 = scmp.lt.u32.totalorder %s1582_s9, %s1880_s2 }
  0x49   :  { %p1588_p6 = pnand %p1586_p5, %p1583_p4 }
  0x4b   :  { %1591 = shalt.err (!%p1588_p6)
}
  0x4c   :  { %s1592_s16 = scalar_lea.vmem %s47_s28, 4096  ;;  %p1597_p8 = scmp.lt.s32.totalorder %s47_s28, %s47_s28 }
  0x4d   :  { %p1593_p7 = scmp.ne.s32.totalorder %s47_s28, %s1592_s16  ;;  %p1598_p9 = scmp.lt.s32.totalorder %s1592_s16, %s1592_s16 }
  0x4f   :  { %p1599_p10 = por %p1598_p9, %p1597_p8 }
  0x51   :  { %p1600_p11 = pnand %p1599_p10, %p1593_p7 }
  0x53   :  { %1603 = shalt.err (!%p1600_p11)
}
  0x54   :  { %s1687_s0 = smov 128   ;;  %s1688_s13 = smov 8  }
  0x55   :  { %52 = dma.hbm_to_vmem [thread:$0]  %s1880_s2, 4096, %s47_s28, [#allocation6], %s1687_s0, %s1687_s0, %s1688_s13  }
  0x56   :  { %s1689_s3 = smov [#allocation10]   ;;  %s1690_s17 = smov [#allocation13]  }
  0x57   :  { %s70_s27 = sshll.u32 %s1689_s3, 4  ;;  %s94_s18 = sshll.u32 %s1690_s17, 4  ;;  %s71_s27 = int_to_ptr.vmem [resolvable:$true] %s70_s27  ;;  %s95_s18 = int_to_ptr.vmem [resolvable:$true] %s94_s18 }
  0x58   :  { %s1604_s21 = scalar_lea.hbm %s1882_s4, 4096 }
  0x59   :  { %p1605_p12 = scmp.ne.s32.totalorder %s1882_s4, %s1604_s21  ;;  %p1608_p13 = scmp.lt.u32.totalorder %s1604_s21, %s1882_s4 }
  0x5b   :  { %p1610_p0 = pnand %p1608_p13, %p1605_p12 }
  0x5d   :  { %1613 = shalt.err (!%p1610_p0)
}
  0x5e   :  { %s1614_s2 = scalar_lea.vmem %s71_s27, 4096  ;;  %p1619_p2 = scmp.lt.s32.totalorder %s71_s27, %s71_s27 }
  0x5f   :  { %p1615_p1 = scmp.ne.s32.totalorder %s71_s27, %s1614_s2  ;;  %p1620_p3 = scmp.lt.s32.totalorder %s1614_s2, %s1614_s2 }
  0x61   :  { %p1621_p4 = por %p1620_p3, %p1619_p2 }
  0x63   :  { %p1622_p5 = pnand %p1621_p4, %p1615_p1 }
  0x65   :  { %1625 = shalt.err (!%p1622_p5)
}
  0x66   :  { %76 = dma.hbm_to_vmem [thread:$0]  %s1882_s4, 4096, %s71_s27, [#allocation9], %s1687_s0, %s1687_s0, %s1688_s13  }
  0x67   :  { %s1626_s29 = scalar_lea.hbm %s1884_s6, 4096 }
  0x68   :  { %p1627_p6 = scmp.ne.s32.totalorder %s1884_s6, %s1626_s29  ;;  %p1630_p7 = scmp.lt.u32.totalorder %s1626_s29, %s1884_s6 }
  0x6a   :  { %p1632_p8 = pnand %p1630_p7, %p1627_p6 }
  0x6c   :  { %1635 = shalt.err (!%p1632_p8)
}
  0x6d   :  { %s1636_s12 = scalar_lea.vmem %s95_s18, 4096  ;;  %p1641_p10 = scmp.lt.s32.totalorder %s95_s18, %s95_s18 }
  0x6e   :  { %p1637_p9 = scmp.ne.s32.totalorder %s95_s18, %s1636_s12  ;;  %p1642_p11 = scmp.lt.s32.totalorder %s1636_s12, %s1636_s12 }
  0x70   :  { %p1643_p12 = por %p1642_p11, %p1641_p10 }
  0x72   :  { %p1644_p13 = pnand %p1643_p12, %p1637_p9 }
  0x74   :  { %1647 = shalt.err (!%p1644_p13)
}
  0x75   :  { %100 = dma.hbm_to_vmem [thread:$0]  %s1884_s6, 4096, %s95_s18, [#allocation12], %s1687_s0, %s1687_s0, %s1688_s13  }
  0x76   :  { %1670 = dma.done.wait [#allocation3], 2048  }
  0x77   :  { %1671 = vsyncadd [#allocation3], 4294965248 }
  0x78   :  { %1672 = dma.done.wait [#allocation6], 5120  }
  0x79   :  { %1673 = vsyncadd [#allocation6], 4294962176 }
  0x7a   :  { %1674 = dma.done.wait [#allocation9], 5120  }
  0x7b   :  { %1675 = vsyncadd [#allocation9], 4294962176 }
  0x7c   :  { %1676 = dma.done.wait [#allocation12], 5120  }
  0x7d   :  { %1677 = vsyncadd [#allocation12], 4294962176  ;;  %v1454_v0 = vld [vmem:[#allocation5] sm:$0xff]   ;;  %v1455_v1 = vld [vmem:[#allocation5 + $0x8] sm:$0xff]   ;;  %s1691_s6 = smov [#allocation14]  }
  0x7e   :  { %1282 = vmatprep.subr.bf16.mxu0 %v1454_v0  ;;  %1426 = vmatprep.subr.bf16.mxu1 %v1454_v0  ;;  %v1456_v2 = vld [vmem:[#allocation5 + $0x10] sm:$0xff]   ;;  %v1457_v3 = vld [vmem:[#allocation5 + $0x18] sm:$0xff]   ;;  %v1462_v4 = vld [vmem:[#allocation2] sm:$0xff]   ;;  %s1155_s16 = sshll.u32 %s1691_s6, 4  ;;  %s1156_s16 = int_to_ptr.vmem [resolvable:$true] %s1155_s16 }
  0x7f   :  { %1283 = vmatpush3.bf16.msra.mxu0 %v1454_v0  ;;  %1434 = vmatpush3.bf16.msra.mxu1 %v1454_v0  ;;  %v1458_v5 = vld [vmem:[#allocation5 + $0x20] sm:$0xff]   ;;  %v1459_v6 = vld [vmem:[#allocation5 + $0x28] sm:$0xff]   ;;  %v1460_v8 = vld [vmem:[#allocation5 + $0x30] sm:$0xff]   ;;  %s1648_s14 = scalar_lea.vmem %s1156_s16, 4096  ;;  %p1653_p1 = scmp.lt.s32.totalorder %s1156_s16, %s1156_s16 }
  0x80   :  { %1284 = vmatprep.subr.bf16.mxu0 %v1455_v1  ;;  %1427 = vmatprep.subr.bf16.mxu1 %v1455_v1  ;;  %v1470_v7 = vld [vmem:[#allocation2 + $0x40] sm:$0xff]   ;;  %v1461_v9 = vld [vmem:[#allocation5 + $0x38] sm:$0xff]   ;;  %v1463_v10 = vld [vmem:[#allocation2 + $0x8] sm:$0xff]   ;;  %p1649_p0 = scmp.ne.s32.totalorder %s1156_s16, %s1648_s14  ;;  %p1654_p2 = scmp.lt.s32.totalorder %s1648_s14, %s1648_s14 }
  0x81   :  { %1298 = vmatprep.mubr.bf16.mxu0 %v1462_v4  ;;  %1314 = vmatprep.mubr.bf16.mxu1 %v1470_v7  ;;  %v1478_v11 = vld [vmem:[#allocation8] sm:$0xff]   ;;  %v1464_v12 = vld [vmem:[#allocation2 + $0x10] sm:$0xff]   ;;  %v1471_v13 = vld [vmem:[#allocation2 + $0x48] sm:$0xff]  }
  0x82   :  { %v1472_v14 = vld [vmem:[#allocation2 + $0x50] sm:$0xff]   ;;  %v1479_v15 = vld [vmem:[#allocation8 + $0x8] sm:$0xff]   ;;  %v1465_v17 = vld [vmem:[#allocation2 + $0x18] sm:$0xff]   ;;  %p1655_p3 = por %p1654_p2, %p1653_p1 }
  0x83   :  { %1285 = vmatpush3.bf16.msra.mxu0 %v1455_v1  ;;  %1435 = vmatpush3.bf16.msra.mxu1 %v1455_v1  ;;  %v1480_v16 = vld [vmem:[#allocation8 + $0x10] sm:$0xff]   ;;  %v1473_v18 = vld [vmem:[#allocation2 + $0x58] sm:$0xff]   ;;  %v1466_v19 = vld [vmem:[#allocation2 + $0x20] sm:$0xff]  }
  0x84   :  { %1286 = vmatprep.subr.bf16.mxu0 %v1456_v2  ;;  %1428 = vmatprep.subr.bf16.mxu1 %v1456_v2  ;;  %v1474_v20 = vld [vmem:[#allocation2 + $0x60] sm:$0xff]   ;;  %v1481_v21 = vld [vmem:[#allocation8 + $0x18] sm:$0xff]   ;;  %v1467_v23 = vld [vmem:[#allocation2 + $0x28] sm:$0xff]   ;;  %p1656_p4 = pnand %p1655_p3, %p1649_p0 }
  0x85   :  { %v1482_v22 = vld [vmem:[#allocation8 + $0x20] sm:$0xff]   ;;  %v1475_v24 = vld [vmem:[#allocation2 + $0x68] sm:$0xff]   ;;  %v1468_v25 = vld [vmem:[#allocation2 + $0x30] sm:$0xff]  }
  0x86   :  { %v1476_v26 = vld [vmem:[#allocation2 + $0x70] sm:$0xff]   ;;  %v1483_v27 = vld [vmem:[#allocation8 + $0x28] sm:$0xff]   ;;  %v1469_v28 = vld [vmem:[#allocation2 + $0x38] sm:$0xff]  }
  0x87   :  { %1287 = vmatpush3.bf16.msra.mxu0 %v1456_v2  ;;  %1436 = vmatpush3.bf16.msra.mxu1 %v1456_v2  ;;  %v1477_v29 = vld [vmem:[#allocation2 + $0x78] sm:$0xff]   ;;  %v1484_v30 = vld [vmem:[#allocation8 + $0x30] sm:$0xff]   ;;  %v1486_v32 = vld [vmem:[#allocation11] sm:$0xff]  }
  0x88   :  { %1288 = vmatprep.subr.bf16.mxu0 %v1457_v3  ;;  %1429 = vmatprep.subr.bf16.mxu1 %v1457_v3  ;;  %v1485_v31 = vld [vmem:[#allocation8 + $0x38] sm:$0xff]   ;;  %v1487_v33 = vld [vmem:[#allocation11 + $0x8] sm:$0xff]   ;;  %v1488_v34 = vld [vmem:[#allocation11 + $0x10] sm:$0xff]  }
  0x89   :  { %v1489_v35 = vld [vmem:[#allocation11 + $0x18] sm:$0xff]   ;;  %v1490_v36 = vld [vmem:[#allocation11 + $0x20] sm:$0xff]   ;;  %v1491_v37 = vld [vmem:[#allocation11 + $0x28] sm:$0xff]  }
  0x8a   :  { %v173_v38 = vld [vmem:[#allocation7 + $0x10] sm:$0xff]  ;;  %v171_v40 = vld [vmem:[#allocation7] sm:$0xff]  ;;  %v174_v43 = vld [vmem:[#allocation7 + $0x18] sm:$0xff] }
  0x8b   :  { %1289 = vmatpush3.bf16.msra.mxu0 %v1457_v3  ;;  %1437 = vmatpush3.bf16.msra.mxu1 %v1457_v3  ;;  %v189_v39 = vld [vmem:[#allocation7 + $0x90] sm:$0xff]  ;;  %v187_v41 = vld [vmem:[#allocation7 + $0x80] sm:$0xff]  ;;  %v190_v45 = vld [vmem:[#allocation7 + $0x98] sm:$0xff] }
  0x8c   :  { %1290 = vmatprep.subr.bf16.mxu0 %v1458_v5  ;;  %1430 = vmatprep.subr.bf16.mxu1 %v1458_v5  ;;  %v172_v48 = vld [vmem:[#allocation7 + $0x8] sm:$0xff]  ;;  %v193_v7 = vld [vmem:[#allocation7 + $0xb0] sm:$0xff] }
  0x8d   :  { %v188_v51 = vld [vmem:[#allocation7 + $0x88] sm:$0xff] }
  0x8f   :  { %1291 = vmatpush3.bf16.msra.mxu0 %v1458_v5  ;;  %1438 = vmatpush3.bf16.msra.mxu1 %v1458_v5  ;;  %v177_v5 = vld [vmem:[#allocation7 + $0x30] sm:$0xff] }
  0x90   :  { %1292 = vmatprep.subr.bf16.mxu0 %v1459_v6  ;;  %1431 = vmatprep.subr.bf16.mxu1 %v1459_v6 }
  0x93   :  { %1293 = vmatpush3.bf16.msra.mxu0 %v1459_v6  ;;  %1439 = vmatpush3.bf16.msra.mxu1 %v1459_v6 }
  0x94   :  { %1294 = vmatprep.subr.bf16.mxu0 %v1460_v8  ;;  %1432 = vmatprep.subr.bf16.mxu1 %v1460_v8 }
  0x97   :  { %1295 = vmatpush3.bf16.msra.mxu0 %v1460_v8  ;;  %1440 = vmatpush3.bf16.msra.mxu1 %v1460_v8 }
  0x98   :  { %1296 = vmatprep.subr.bf16.mxu0 %v1461_v9  ;;  %1433 = vmatprep.subr.bf16.mxu1 %v1461_v9 }
  0x9b   :  { %1297 = vmatpush3.bf16.msra.mxu0 %v1461_v9  ;;  %1441 = vmatpush3.bf16.msra.mxu1 %v1461_v9  ;;  %v175_v9 = vld [vmem:[#allocation7 + $0x20] sm:$0xff] }
  0x9c   :  { %1330 = vmatprep.subr.bf16.mxu1 %v1478_v11  ;;  %1378 = vmatprep.subr.bf16.mxu0 %v1486_v32 }
  0x9e   :  { %1299 = vmatmul.mubr.bf16.vlgmr.msra.gmra.mrb[0].mxu0 %v1463_v10  ;;  %1315 = vmatmul.mubr.bf16.vlgmr.msra.gmra.mrb[0].mxu1 %v1471_v13 }
  0x9f   :  { %1302 = vmatprep.mubr.bf16.mxu0 %v1464_v12  ;;  %1318 = vmatprep.mubr.bf16.mxu1 %v1472_v14  ;;  %v178_v14 = vld [vmem:[#allocation7 + $0x38] sm:$0xff] }
  0xa0   :  { %1331 = vmatpush3.bf16.msra.mxu1 %v1478_v11  ;;  %1379 = vmatpush3.bf16.msra.mxu0 %v1486_v32  ;;  %v191_v11 = vld [vmem:[#allocation7 + $0xa0] sm:$0xff] }
  0xa1   :  { %1332 = vmatprep.subr.bf16.mxu1 %v1479_v15  ;;  %1380 = vmatprep.subr.bf16.mxu0 %v1487_v33 }
  0xa4   :  { %1333 = vmatpush3.bf16.msra.mxu1 %v1479_v15  ;;  %1381 = vmatpush3.bf16.msra.mxu0 %v1487_v33 }
  0xa5   :  { %1334 = vmatprep.subr.bf16.mxu1 %v1480_v16  ;;  %1382 = vmatprep.subr.bf16.mxu0 %v1488_v34 }
  0xa6   :  { %1303 = vmatmul.mubr.bf16.gmra.mrb[4].mxu0 %v1465_v17  ;;  %1319 = vmatmul.mubr.bf16.gmra.mrb[4].mxu1 %v1473_v18  ;;  %v194_v17 = vld [vmem:[#allocation7 + $0xb8] sm:$0xff] }
  0xa7   :  { %1306 = vmatprep.mubr.bf16.mxu0 %v1466_v19  ;;  %1322 = vmatprep.mubr.bf16.mxu1 %v1474_v20  ;;  %v176_v20 = vld [vmem:[#allocation7 + $0x28] sm:$0xff] }
  0xa8   :  { %1335 = vmatpush3.bf16.msra.mxu1 %v1480_v16  ;;  %1383 = vmatpush3.bf16.msra.mxu0 %v1488_v34 }
  0xa9   :  { %1336 = vmatprep.subr.bf16.mxu1 %v1481_v21  ;;  %1384 = vmatprep.subr.bf16.mxu0 %v1489_v35 }
  0xac   :  { %1337 = vmatpush3.bf16.msra.mxu1 %v1481_v21  ;;  %1385 = vmatpush3.bf16.msra.mxu0 %v1489_v35 }
  0xad   :  { %1338 = vmatprep.subr.bf16.mxu1 %v1482_v22  ;;  %1386 = vmatprep.subr.bf16.mxu0 %v1490_v36 }
  0xae   :  { %1307 = vmatmul.mubr.bf16.gmra.mrb[8].mxu0 %v1467_v23  ;;  %1323 = vmatmul.mubr.bf16.gmra.mrb[8].mxu1 %v1475_v24  ;;  %v192_v23 = vld [vmem:[#allocation7 + $0xa8] sm:$0xff] }
  0xaf   :  { %1310 = vmatprep.mubr.bf16.mxu0 %v1468_v25  ;;  %1326 = vmatprep.mubr.bf16.mxu1 %v1476_v26 }
  0xb0   :  { %1339 = vmatpush3.bf16.msra.mxu1 %v1482_v22  ;;  %1387 = vmatpush3.bf16.msra.mxu0 %v1490_v36 }
  0xb1   :  { %1340 = vmatprep.subr.bf16.mxu1 %v1483_v27  ;;  %1388 = vmatprep.subr.bf16.mxu0 %v1491_v37 }
  0xb4   :  { %1341 = vmatpush3.bf16.msra.mxu1 %v1483_v27  ;;  %1389 = vmatpush3.bf16.msra.mxu0 %v1491_v37 }
  0xb5   :  { %1342 = vmatprep.subr.bf16.mxu1 %v1484_v30 }
  0xb6   :  { %1311 = vmatmul.mubr.bf16.gmra.mrb[12].mxu0 %v1469_v28  ;;  %1327 = vmatmul.mubr.bf16.gmra.mrb[12].mxu1 %v1477_v29 }
  0xb8   :  { %1343 = vmatpush3.bf16.msra.mxu1 %v1484_v30 }
  0xb9   :  { %1344 = vmatprep.subr.bf16.mxu1 %v1485_v31 }
  0xbc   :  { %1345 = vmatpush3.bf16.msra.mxu1 %v1485_v31 }
 0x171   :  { %v1300_v42 = vpop.f32.mrb[0].mxu0  ;;  %v1316_v44 = vpop.f32.mrb[0].mxu1 }
 0x172   :  { %v390_v46 = vadd.f32 %v1300_v42, %v173_v38  ;;  %v381_v47 = vpop.f32.mrb[1].mxu0  ;;  %v454_v49 = vadd.f32 %v1316_v44, %v189_v39  ;;  %v445_v50 = vpop.f32.mrb[1].mxu1 }
 0x173   :  { %v382_v52 = vadd.f32 %v381_v47, %v171_v40  ;;  %v1301_v53 = vpop.f32.mrb[2].mxu0  ;;  %v446_v54 = vadd.f32 %v445_v50, %v187_v41  ;;  %v1317_v55 = vpop.f32.mrb[2].mxu1  ;;  %v181_v41 = vld [vmem:[#allocation7 + $0x50] sm:$0xff]  ;;  %v195_v47 = vld [vmem:[#allocation7 + $0xc0] sm:$0xff]  ;;  %v182_v50 = vld [vmem:[#allocation7 + $0x58] sm:$0xff] }
 0x174   :  { %v393_v56 = vadd.f32 %v1301_v53, %v174_v43  ;;  %v384_v57 = vpop.f32.mrb[3].mxu0  ;;  %v526_v58 = vmax.f32 %v454_v49, 0.0  ;;  %v457_v59 = vadd.f32 %v1317_v55, %v190_v45  ;;  %v448_v60 = vpop.f32.mrb[3].mxu1  ;;  %v510_v0 = vmax.f32 %v390_v46, 0.0  ;;  %v197_v43 = vld [vmem:[#allocation7 + $0xd0] sm:$0xff]  ;;  %v179_v45 = vld [vmem:[#allocation7 + $0x40] sm:$0xff] }
 0x175   :  { %v385_v61 = vadd.f32 %v384_v57, %v172_v48  ;;  %v524_v62 = vmax.f32 %v446_v54, 0.0  ;;  %v449_v63 = vadd.f32 %v448_v60, %v188_v51  ;;  %v508_v3 = vmax.f32 %v382_v52, 0.0  ;;  %v198_v53 = vld [vmem:[#allocation7 + $0xd8] sm:$0xff] }
 0x176   :  { %v511_v1 = vmax.f32 %v393_v56, 0.0  ;;  %v527_v2 = vmax.f32 %v457_v59, 0.0  ;;  %v180_v56 = vld [vmem:[#allocation7 + $0x48] sm:$0xff] }
 0x177   :  { %v509_v4 = vmax.f32 %v385_v61, 0.0  ;;  %v525_v6 = vmax.f32 %v449_v63, 0.0  ;;  %v196_v59 = vld [vmem:[#allocation7 + $0xc8] sm:$0xff] }
 0x178   :  { %v541_v8 = vpack.c.bf16 %v511_v1, %v510_v0  ;;  %v1851_v10 = vpack.c.bf16 %v527_v2, %v526_v58 }
 0x179   :  { %v540_v12 = vpack.c.bf16 %v509_v4, %v508_v3  ;;  %v1304_v13 = vpop.f32.mrb[4].mxu0  ;;  %v1853_v15 = vpack.c.bf16 %v525_v6, %v524_v62  ;;  %v1320_v16 = vpop.f32.mrb[4].mxu1 }
 0x17a   :  { %v406_v18 = vadd.f32 %v1304_v13, %v177_v5  ;;  %v397_v19 = vpop.f32.mrb[5].mxu0  ;;  %v470_v21 = vadd.f32 %v1320_v16, %v193_v7  ;;  %v461_v22 = vpop.f32.mrb[5].mxu1 }
 0x17b   :  { %v398_v24 = vadd.f32 %v397_v19, %v175_v9  ;;  %v1305_v25 = vpop.f32.mrb[6].mxu0  ;;  %1346 = vmatprep.mubr.bf16.mxu1 %v540_v12  ;;  %v462_v26 = vadd.f32 %v461_v22, %v191_v11  ;;  %v1321_v27 = vpop.f32.mrb[6].mxu1  ;;  %v183_v19 = vld [vmem:[#allocation7 + $0x60] sm:$0xff] }
 0x17c   :  { %v409_v28 = vadd.f32 %v1305_v25, %v178_v14  ;;  %v400_v29 = vpop.f32.mrb[7].mxu0  ;;  %1347 = vmatmul.mubr.bf16.vlgmr.msra.gmra.mrb[16].mxu1 %v541_v8  ;;  %v530_v30 = vmax.f32 %v470_v21, 0.0  ;;  %v473_v31 = vadd.f32 %v1321_v27, %v194_v17  ;;  %v464_v32 = vpop.f32.mrb[7].mxu1  ;;  %v514_v36 = vmax.f32 %v406_v18, 0.0  ;;  %v185_v14 = vld [vmem:[#allocation7 + $0x70] sm:$0xff]  ;;  %v199_v21 = vld [vmem:[#allocation7 + $0xe0] sm:$0xff] }
 0x17d   :  { %v401_v33 = vadd.f32 %v400_v29, %v176_v20  ;;  %v528_v34 = vmax.f32 %v462_v26, 0.0  ;;  %v465_v35 = vadd.f32 %v464_v32, %v192_v23  ;;  %v512_v39 = vmax.f32 %v398_v24, 0.0  ;;  %v201_v17 = vld [vmem:[#allocation7 + $0xf0] sm:$0xff]  ;;  %v186_v24 = vld [vmem:[#allocation7 + $0x78] sm:$0xff] }
 0x17e   :  { %v515_v37 = vmax.f32 %v409_v28, 0.0  ;;  %v531_v38 = vmax.f32 %v473_v31, 0.0  ;;  %v202_v27 = vld [vmem:[#allocation7 + $0xf8] sm:$0xff] }
 0x17f   :  { %v513_v40 = vmax.f32 %v401_v33, 0.0  ;;  %v529_v42 = vmax.f32 %v465_v35, 0.0  ;;  %v200_v33 = vld [vmem:[#allocation7 + $0xe8] sm:$0xff] }
 0x180   :  { %v543_v44 = vpack.c.bf16 %v515_v37, %v514_v36  ;;  %v1855_v46 = vpack.c.bf16 %v531_v38, %v530_v30  ;;  %v184_v30 = vld [vmem:[#allocation7 + $0x68] sm:$0xff] }
 0x181   :  { %v542_v48 = vpack.c.bf16 %v513_v40, %v512_v39  ;;  %v1308_v49 = vpop.f32.mrb[8].mxu0  ;;  %v1857_v51 = vpack.c.bf16 %v529_v42, %v528_v34  ;;  %v1324_v52 = vpop.f32.mrb[8].mxu1 }
 0x182   :  { %v422_v54 = vadd.f32 %v1308_v49, %v181_v41  ;;  %v413_v55 = vpop.f32.mrb[9].mxu0  ;;  %v486_v57 = vadd.f32 %v1324_v52, %v197_v43  ;;  %v477_v58 = vpop.f32.mrb[9].mxu1 }
 0x183   :  { %v414_v60 = vadd.f32 %v413_v55, %v179_v45  ;;  %v1309_v61 = vpop.f32.mrb[10].mxu0  ;;  %1350 = vmatprep.mubr.bf16.mxu1 %v542_v48  ;;  %v478_v62 = vadd.f32 %v477_v58, %v195_v47  ;;  %v1325_v63 = vpop.f32.mrb[10].mxu1  ;;  %v1492_v58 = vld [vmem:[#allocation11 + $0x30] sm:$0xff]  }
 0x184   :  { %v425_v0 = vadd.f32 %v1309_v61, %v182_v50  ;;  %v416_v1 = vpop.f32.mrb[11].mxu0  ;;  %1351 = vmatmul.mubr.bf16.gmra.mrb[20].mxu1 %v543_v44  ;;  %v534_v2 = vmax.f32 %v486_v57, 0.0  ;;  %v489_v3 = vadd.f32 %v1325_v63, %v198_v53  ;;  %v480_v4 = vpop.f32.mrb[11].mxu1  ;;  %v518_v8 = vmax.f32 %v422_v54, 0.0  ;;  %1390 = vmatprep.subr.bf16.mxu0 %v1492_v58  ;;  %v572_v61 = vld [vmem:[#allocation10] sm:$0xff] }
 0x185   :  { %v417_v5 = vadd.f32 %v416_v1, %v180_v56  ;;  %v532_v6 = vmax.f32 %v478_v62, 0.0  ;;  %v481_v7 = vadd.f32 %v480_v4, %v196_v59  ;;  %v516_v12 = vmax.f32 %v414_v60, 0.0  ;;  %1391 = vmatpush3.bf16.msra.mxu0 %v1492_v58  ;;  %v1493_v59 = vld [vmem:[#allocation11 + $0x38] sm:$0xff]   ;;  %v574_v60 = vld [vmem:[#allocation10 + $0x10] sm:$0xff] }
 0x186   :  { %v519_v9 = vmax.f32 %v425_v0, 0.0  ;;  %v535_v11 = vmax.f32 %v489_v3, 0.0  ;;  %1392 = vmatprep.subr.bf16.mxu0 %v1493_v59  ;;  %v573_v0 = vld [vmem:[#allocation10 + $0x8] sm:$0xff] }
 0x187   :  { %v517_v13 = vmax.f32 %v417_v5, 0.0  ;;  %v533_v16 = vmax.f32 %v481_v7, 0.0 }
 0x188   :  { %v545_v18 = vpack.c.bf16 %v519_v9, %v518_v8  ;;  %v553_v20 = vpack.c.bf16 %v535_v11, %v534_v2  ;;  %v578_v8 = vld [vmem:[#allocation10 + $0x30] sm:$0xff]  ;;  %v576_v11 = vld [vmem:[#allocation10 + $0x20] sm:$0xff] }
 0x189   :  { %v544_v22 = vpack.c.bf16 %v517_v13, %v516_v12  ;;  %v1312_v23 = vpop.f32.mrb[12].mxu0  ;;  %v552_v25 = vpack.c.bf16 %v533_v16, %v532_v6  ;;  %v1328_v26 = vpop.f32.mrb[12].mxu1  ;;  %1393 = vmatpush3.bf16.msra.mxu0 %v1493_v59 }
 0x18a   :  { %v438_v28 = vadd.f32 %v1312_v23, %v185_v14  ;;  %v429_v29 = vpop.f32.mrb[13].mxu0  ;;  %v502_v31 = vadd.f32 %v1328_v26, %v201_v17  ;;  %v493_v32 = vpop.f32.mrb[13].mxu1  ;;  %v579_v14 = vld [vmem:[#allocation10 + $0x38] sm:$0xff] }
 0x18b   :  { %v430_v34 = vadd.f32 %v429_v29, %v183_v19  ;;  %v1313_v35 = vpop.f32.mrb[14].mxu0  ;;  %1354 = vmatprep.mubr.bf16.mxu1 %v544_v22  ;;  %v494_v36 = vadd.f32 %v493_v32, %v199_v21  ;;  %v1329_v37 = vpop.f32.mrb[14].mxu1 }
 0x18c   :  { %v441_v38 = vadd.f32 %v1313_v35, %v186_v24  ;;  %v432_v39 = vpop.f32.mrb[15].mxu0  ;;  %1355 = vmatmul.mubr.bf16.gmra.mrb[24].mxu1 %v545_v18  ;;  %v538_v40 = vmax.f32 %v502_v31, 0.0  ;;  %v505_v41 = vadd.f32 %v1329_v37, %v202_v27  ;;  %v496_v42 = vpop.f32.mrb[15].mxu1  ;;  %v522_v47 = vmax.f32 %v438_v28, 0.0  ;;  %v577_v18 = vld [vmem:[#allocation10 + $0x28] sm:$0xff]  ;;  %v582_v28 = vld [vmem:[#allocation10 + $0x50] sm:$0xff] }
 0x18d   :  { %v433_v43 = vadd.f32 %v432_v39, %v184_v30  ;;  %v536_v44 = vmax.f32 %v494_v36, 0.0  ;;  %v497_v45 = vadd.f32 %v496_v42, %v200_v33  ;;  %v520_v50 = vmax.f32 %v430_v34, 0.0  ;;  %v580_v30 = vld [vmem:[#allocation10 + $0x40] sm:$0xff]  ;;  %v583_v33 = vld [vmem:[#allocation10 + $0x58] sm:$0xff]  ;;  %v581_v36 = vld [vmem:[#allocation10 + $0x48] sm:$0xff] }
 0x18e   :  { %v523_v48 = vmax.f32 %v441_v38, 0.0  ;;  %v539_v49 = vmax.f32 %v505_v41, 0.0 }
 0x18f   :  { %v521_v52 = vmax.f32 %v433_v43, 0.0  ;;  %v537_v53 = vmax.f32 %v497_v45, 0.0 }
 0x190   :  { %v547_v54 = vpack.c.bf16 %v523_v48, %v522_v47  ;;  %v555_v55 = vpack.c.bf16 %v539_v49, %v538_v40  ;;  %v586_v47 = vld [vmem:[#allocation10 + $0x70] sm:$0xff]  ;;  %v584_v49 = vld [vmem:[#allocation10 + $0x60] sm:$0xff] }
 0x191   :  { %v546_v56 = vpack.c.bf16 %v521_v52, %v520_v50  ;;  %v554_v57 = vpack.c.bf16 %v537_v53, %v536_v44  ;;  %v587_v53 = vld [vmem:[#allocation10 + $0x78] sm:$0xff] }
 0x193   :  { %1358 = vmatprep.mubr.bf16.mxu1 %v546_v56  ;;  %v585_v56 = vld [vmem:[#allocation10 + $0x68] sm:$0xff] }
 0x194   :  { %1359 = vmatmul.mubr.bf16.gmra.mrb[28].mxu1 %v547_v54 }
 0x195   :  { %1362 = vmatprep.mubr.bf16.mxu1 %v1853_v15  ;;  %v575_v15 = vld [vmem:[#allocation10 + $0x18] sm:$0xff] }
 0x19c   :  { %1363 = vmatmul.mubr.bf16.gmra.mrb[32].mxu1 %v1851_v10 }
 0x19d   :  { %1366 = vmatprep.mubr.bf16.mxu1 %v1857_v51 }
 0x1a4   :  { %1367 = vmatmul.mubr.bf16.gmra.mrb[36].mxu1 %v1855_v46 }
 0x1a5   :  { %1370 = vmatprep.mubr.bf16.mxu1 %v552_v25 }
 0x1ac   :  { %1371 = vmatmul.mubr.bf16.gmra.mrb[40].mxu1 %v553_v20 }
 0x1ad   :  { %1374 = vmatprep.mubr.bf16.mxu1 %v554_v57 }
 0x1b4   :  { %1375 = vmatmul.mubr.bf16.gmra.mrb[44].mxu1 %v555_v55 }
 0x24f   :  { %v1348_v62 = vpop.f32.mrb[16].mxu1 }
 0x250   :  { %v695_v63 = vadd.f32 %v1348_v62, %v574_v60  ;;  %v686_v10 = vpop.f32.mrb[17].mxu1 }
 0x251   :  { %v687_v51 = vadd.f32 %v686_v10, %v572_v61  ;;  %v1349_v1 = vpop.f32.mrb[18].mxu1 }
 0x252   :  { %v698_v46 = vadd.f32 %v1349_v1, %v575_v15  ;;  %v689_v2 = vpop.f32.mrb[19].mxu1  ;;  %v815_v4 = vmax.f32 %v695_v63, 0.0  ;;  %v588_v1 = vld [vmem:[#allocation10 + $0x80] sm:$0xff] }
 0x253   :  { %v690_v3 = vadd.f32 %v689_v2, %v573_v0  ;;  %v813_v6 = vmax.f32 %v687_v51, 0.0  ;;  %v590_v0 = vld [vmem:[#allocation10 + $0x90] sm:$0xff] }
 0x254   :  { %v816_v5 = vmax.f32 %v698_v46, 0.0 }
 0x255   :  { %v814_v7 = vmax.f32 %v690_v3, 0.0  ;;  %v591_v3 = vld [vmem:[#allocation10 + $0x98] sm:$0xff] }
 0x256   :  { %v846_v9 = vpack.c.bf16 %v816_v5, %v815_v4 }
 0x257   :  { %v845_v12 = vpack.c.bf16 %v814_v7, %v813_v6  ;;  %v1352_v13 = vpop.f32.mrb[20].mxu1  ;;  %v589_v6 = vld [vmem:[#allocation10 + $0x88] sm:$0xff] }
 0x258   :  { %v711_v16 = vadd.f32 %v1352_v13, %v578_v8  ;;  %v702_v17 = vpop.f32.mrb[21].mxu1 }
 0x259   :  { %v703_v19 = vadd.f32 %v702_v17, %v576_v11  ;;  %v1353_v20 = vpop.f32.mrb[22].mxu1  ;;  %1394 = vmatprep.mubr.bf16.mxu0 %v845_v12 }
 0x25a   :  { %v714_v21 = vadd.f32 %v1353_v20, %v579_v14  ;;  %v705_v22 = vpop.f32.mrb[23].mxu1  ;;  %1395 = vmatmul.mubr.bf16.vlgmr.msra.gmra.mrb[16].mxu0 %v846_v9  ;;  %v819_v24 = vmax.f32 %v711_v16, 0.0  ;;  %v592_v20 = vld [vmem:[#allocation10 + $0xa0] sm:$0xff] }
 0x25b   :  { %v706_v23 = vadd.f32 %v705_v22, %v577_v18  ;;  %v817_v26 = vmax.f32 %v703_v19, 0.0  ;;  %v594_v18 = vld [vmem:[#allocation10 + $0xb0] sm:$0xff] }
 0x25c   :  { %v820_v25 = vmax.f32 %v714_v21, 0.0 }
 0x25d   :  { %v818_v27 = vmax.f32 %v706_v23, 0.0  ;;  %v595_v23 = vld [vmem:[#allocation10 + $0xb8] sm:$0xff] }
 0x25e   :  { %v848_v29 = vpack.c.bf16 %v820_v25, %v819_v24 }
 0x25f   :  { %v847_v31 = vpack.c.bf16 %v818_v27, %v817_v26  ;;  %v1356_v32 = vpop.f32.mrb[24].mxu1  ;;  %v593_v26 = vld [vmem:[#allocation10 + $0xa8] sm:$0xff] }
 0x260   :  { %v727_v34 = vadd.f32 %v1356_v32, %v582_v28  ;;  %v718_v35 = vpop.f32.mrb[25].mxu1 }
 0x261   :  { %v719_v37 = vadd.f32 %v718_v35, %v580_v30  ;;  %v1357_v38 = vpop.f32.mrb[26].mxu1  ;;  %1398 = vmatprep.mubr.bf16.mxu0 %v847_v31 }
 0x262   :  { %v730_v39 = vadd.f32 %v1357_v38, %v583_v33  ;;  %v721_v40 = vpop.f32.mrb[27].mxu1  ;;  %1399 = vmatmul.mubr.bf16.gmra.mrb[20].mxu0 %v848_v29  ;;  %v823_v42 = vmax.f32 %v727_v34, 0.0  ;;  %v596_v38 = vld [vmem:[#allocation10 + $0xc0] sm:$0xff] }
 0x263   :  { %v722_v41 = vadd.f32 %v721_v40, %v581_v36  ;;  %v821_v44 = vmax.f32 %v719_v37, 0.0  ;;  %v598_v36 = vld [vmem:[#allocation10 + $0xd0] sm:$0xff] }
 0x264   :  { %v824_v43 = vmax.f32 %v730_v39, 0.0 }
 0x265   :  { %v822_v45 = vmax.f32 %v722_v41, 0.0  ;;  %v599_v41 = vld [vmem:[#allocation10 + $0xd8] sm:$0xff] }
 0x266   :  { %v850_v48 = vpack.c.bf16 %v824_v43, %v823_v42 }
 0x267   :  { %v849_v50 = vpack.c.bf16 %v822_v45, %v821_v44  ;;  %v1360_v52 = vpop.f32.mrb[28].mxu1  ;;  %v597_v44 = vld [vmem:[#allocation10 + $0xc8] sm:$0xff] }
 0x268   :  { %v743_v54 = vadd.f32 %v1360_v52, %v586_v47  ;;  %v734_v55 = vpop.f32.mrb[29].mxu1 }
 0x269   :  { %v735_v57 = vadd.f32 %v734_v55, %v584_v49  ;;  %v1361_v58 = vpop.f32.mrb[30].mxu1  ;;  %1402 = vmatprep.mubr.bf16.mxu0 %v849_v50 }
 0x26a   :  { %v746_v59 = vadd.f32 %v1361_v58, %v587_v53  ;;  %v737_v60 = vpop.f32.mrb[31].mxu1  ;;  %1403 = vmatmul.mubr.bf16.gmra.mrb[24].mxu0 %v850_v48  ;;  %v827_v62 = vmax.f32 %v743_v54, 0.0  ;;  %v600_v58 = vld [vmem:[#allocation10 + $0xe0] sm:$0xff] }
 0x26b   :  { %v738_v61 = vadd.f32 %v737_v60, %v585_v56  ;;  %v825_v63 = vmax.f32 %v735_v57, 0.0  ;;  %v602_v56 = vld [vmem:[#allocation10 + $0xf0] sm:$0xff] }
 0x26c   :  { %v828_v15 = vmax.f32 %v746_v59, 0.0 }
 0x26d   :  { %v826_v10 = vmax.f32 %v738_v61, 0.0  ;;  %v603_v61 = vld [vmem:[#allocation10 + $0xf8] sm:$0xff] }
 0x26e   :  { %v852_v51 = vpack.c.bf16 %v828_v15, %v827_v62 }
 0x26f   :  { %v851_v46 = vpack.c.bf16 %v826_v10, %v825_v63  ;;  %v1364_v2 = vpop.f32.mrb[32].mxu1  ;;  %v601_v63 = vld [vmem:[#allocation10 + $0xe8] sm:$0xff] }
 0x270   :  { %v759_v4 = vadd.f32 %v1364_v2, %v590_v0  ;;  %v750_v5 = vpop.f32.mrb[33].mxu1 }
 0x271   :  { %v751_v7 = vadd.f32 %v750_v5, %v588_v1  ;;  %v1365_v8 = vpop.f32.mrb[34].mxu1  ;;  %1406 = vmatprep.mubr.bf16.mxu0 %v851_v46 }
 0x272   :  { %v762_v9 = vadd.f32 %v1365_v8, %v591_v3  ;;  %v753_v11 = vpop.f32.mrb[35].mxu1  ;;  %1407 = vmatmul.mubr.bf16.gmra.mrb[28].mxu0 %v852_v51  ;;  %v831_v13 = vmax.f32 %v759_v4, 0.0  ;;  %v879_v8 = vld [vmem:[#allocation13 + $0x10] sm:$0xff] }
 0x273   :  { %v754_v12 = vadd.f32 %v753_v11, %v589_v6  ;;  %v829_v16 = vmax.f32 %v751_v7, 0.0 }
 0x274   :  { %v832_v14 = vmax.f32 %v762_v9, 0.0  ;;  %v877_v9 = vld [vmem:[#allocation13] sm:$0xff] }
 0x275   :  { %v830_v17 = vmax.f32 %v754_v12, 0.0  ;;  %v880_v12 = vld [vmem:[#allocation13 + $0x18] sm:$0xff] }
 0x276   :  { %v854_v19 = vpack.c.bf16 %v832_v14, %v831_v13 }
 0x277   :  { %v853_v21 = vpack.c.bf16 %v830_v17, %v829_v16  ;;  %v1368_v22 = vpop.f32.mrb[36].mxu1  ;;  %v878_v16 = vld [vmem:[#allocation13 + $0x8] sm:$0xff] }
 0x278   :  { %v775_v24 = vadd.f32 %v1368_v22, %v594_v18  ;;  %v766_v25 = vpop.f32.mrb[37].mxu1  ;;  %v883_v22 = vld [vmem:[#allocation13 + $0x30] sm:$0xff] }
 0x279   :  { %v767_v27 = vadd.f32 %v766_v25, %v592_v20  ;;  %v1369_v28 = vpop.f32.mrb[38].mxu1  ;;  %1410 = vmatprep.mubr.bf16.mxu0 %v853_v21  ;;  %v884_v25 = vld [vmem:[#allocation13 + $0x38] sm:$0xff] }
 0x27a   :  { %v778_v29 = vadd.f32 %v1369_v28, %v595_v23  ;;  %v769_v30 = vpop.f32.mrb[39].mxu1  ;;  %1411 = vmatmul.mubr.bf16.gmra.mrb[32].mxu0 %v854_v19  ;;  %v835_v32 = vmax.f32 %v775_v24, 0.0  ;;  %v881_v23 = vld [vmem:[#allocation13 + $0x20] sm:$0xff]  ;;  %v882_v28 = vld [vmem:[#allocation13 + $0x28] sm:$0xff] }
 0x27b   :  { %v770_v31 = vadd.f32 %v769_v30, %v593_v26  ;;  %v833_v34 = vmax.f32 %v767_v27, 0.0 }
 0x27c   :  { %v836_v33 = vmax.f32 %v778_v29, 0.0 }
 0x27d   :  { %v834_v35 = vmax.f32 %v770_v31, 0.0 }
 0x27e   :  { %v856_v37 = vpack.c.bf16 %v836_v33, %v835_v32 }
 0x27f   :  { %v855_v39 = vpack.c.bf16 %v834_v35, %v833_v34  ;;  %v1372_v40 = vpop.f32.mrb[40].mxu1  ;;  %v887_v34 = vld [vmem:[#allocation13 + $0x50] sm:$0xff]  ;;  %v885_v35 = vld [vmem:[#allocation13 + $0x40] sm:$0xff] }
 0x280   :  { %v791_v42 = vadd.f32 %v1372_v40, %v598_v36  ;;  %v782_v43 = vpop.f32.mrb[41].mxu1  ;;  %v886_v40 = vld [vmem:[#allocation13 + $0x48] sm:$0xff] }
 0x281   :  { %v783_v45 = vadd.f32 %v782_v43, %v596_v38  ;;  %v1373_v47 = vpop.f32.mrb[42].mxu1  ;;  %1414 = vmatprep.mubr.bf16.mxu0 %v855_v39 }
 0x282   :  { %v794_v48 = vadd.f32 %v1373_v47, %v599_v41  ;;  %v785_v49 = vpop.f32.mrb[43].mxu1  ;;  %1415 = vmatmul.mubr.bf16.gmra.mrb[36].mxu0 %v856_v37  ;;  %v839_v52 = vmax.f32 %v791_v42, 0.0  ;;  %v888_v37 = vld [vmem:[#allocation13 + $0x58] sm:$0xff]  ;;  %v891_v47 = vld [vmem:[#allocation13 + $0x70] sm:$0xff] }
 0x283   :  { %v786_v50 = vadd.f32 %v785_v49, %v597_v44  ;;  %v837_v54 = vmax.f32 %v783_v45, 0.0 }
 0x284   :  { %v840_v53 = vmax.f32 %v794_v48, 0.0  ;;  %v889_v48 = vld [vmem:[#allocation13 + $0x60] sm:$0xff] }
 0x285   :  { %v838_v55 = vmax.f32 %v786_v50, 0.0  ;;  %v892_v50 = vld [vmem:[#allocation13 + $0x78] sm:$0xff] }
 0x286   :  { %v858_v57 = vpack.c.bf16 %v840_v53, %v839_v52 }
 0x287   :  { %v857_v59 = vpack.c.bf16 %v838_v55, %v837_v54  ;;  %v1376_v60 = vpop.f32.mrb[44].mxu1  ;;  %v890_v54 = vld [vmem:[#allocation13 + $0x68] sm:$0xff] }
 0x288   :  { %v807_v62 = vadd.f32 %v1376_v60, %v602_v56  ;;  %v798_v15 = vpop.f32.mrb[45].mxu1  ;;  %v895_v60 = vld [vmem:[#allocation13 + $0x90] sm:$0xff] }
 0x289   :  { %v799_v10 = vadd.f32 %v798_v15, %v600_v58  ;;  %v1377_v0 = vpop.f32.mrb[46].mxu1  ;;  %1418 = vmatprep.mubr.bf16.mxu0 %v857_v59  ;;  %v896_v15 = vld [vmem:[#allocation13 + $0x98] sm:$0xff] }
 0x28a   :  { %v810_v51 = vadd.f32 %v1377_v0, %v603_v61  ;;  %v801_v1 = vpop.f32.mrb[47].mxu1  ;;  %1419 = vmatmul.mubr.bf16.gmra.mrb[40].mxu0 %v858_v57  ;;  %v843_v2 = vmax.f32 %v807_v62, 0.0  ;;  %v893_v61 = vld [vmem:[#allocation13 + $0x80] sm:$0xff]  ;;  %v894_v0 = vld [vmem:[#allocation13 + $0x88] sm:$0xff] }
 0x28b   :  { %v802_v46 = vadd.f32 %v801_v1, %v601_v63  ;;  %v841_v4 = vmax.f32 %v799_v10, 0.0 }
 0x28c   :  { %v844_v3 = vmax.f32 %v810_v51, 0.0 }
 0x28d   :  { %v842_v5 = vmax.f32 %v802_v46, 0.0 }
 0x28e   :  { %v860_v6 = vpack.c.bf16 %v844_v3, %v843_v2 }
 0x28f   :  { %v859_v7 = vpack.c.bf16 %v842_v5, %v841_v4  ;;  %v899_v4 = vld [vmem:[#allocation13 + $0xb0] sm:$0xff]  ;;  %v897_v5 = vld [vmem:[#allocation13 + $0xa0] sm:$0xff] }
 0x291   :  { %1422 = vmatprep.mubr.bf16.mxu0 %v859_v7  ;;  %v900_v7 = vld [vmem:[#allocation13 + $0xb8] sm:$0xff] }
 0x292   :  { %1423 = vmatmul.mubr.bf16.gmra.mrb[44].mxu0 %v860_v6 }
 0x32d   :  { %v1396_v11 = vpop.f32.mrb[16].mxu0 }
 0x32e   :  { %v1000_v13 = vadd.f32 %v1396_v11, %v879_v8  ;;  %v991_v14 = vpop.f32.mrb[17].mxu0  ;;  %v898_v11 = vld [vmem:[#allocation13 + $0xa8] sm:$0xff] }
 0x32f   :  { %v992_v17 = vadd.f32 %v991_v14, %v877_v9  ;;  %v1397_v18 = vpop.f32.mrb[18].mxu0 }
 0x330   :  { %1120 = vst [vmem:[#allocation14 + $0x10] sm:$0xff] %v1000_v13  ;;  %v1003_v19 = vadd.f32 %v1397_v18, %v880_v12  ;;  %v994_v20 = vpop.f32.mrb[19].mxu0  ;;  %v903_v18 = vld [vmem:[#allocation13 + $0xd0] sm:$0xff] }
 0x331   :  { %1118 = vst [vmem:[#allocation14] sm:$0xff] %v992_v17  ;;  %v995_v21 = vadd.f32 %v994_v20, %v878_v16 }
 0x332   :  { %1121 = vst [vmem:[#allocation14 + $0x18] sm:$0xff] %v1003_v19  ;;  %v901_v19 = vld [vmem:[#allocation13 + $0xc0] sm:$0xff] }
 0x333   :  { %1119 = vst [vmem:[#allocation14 + $0x8] sm:$0xff] %v995_v21  ;;  %v904_v21 = vld [vmem:[#allocation13 + $0xd8] sm:$0xff] }
 0x335   :  { %v1400_v24 = vpop.f32.mrb[20].mxu0 }
 0x336   :  { %v1016_v26 = vadd.f32 %v1400_v24, %v883_v22  ;;  %v1007_v27 = vpop.f32.mrb[21].mxu0  ;;  %v902_v24 = vld [vmem:[#allocation13 + $0xc8] sm:$0xff] }
 0x337   :  { %v1008_v29 = vadd.f32 %v1007_v27, %v881_v23  ;;  %v1401_v30 = vpop.f32.mrb[22].mxu0 }
 0x338   :  { %1124 = vst [vmem:[#allocation14 + $0x30] sm:$0xff] %v1016_v26  ;;  %v1019_v31 = vadd.f32 %v1401_v30, %v884_v25  ;;  %v1010_v32 = vpop.f32.mrb[23].mxu0  ;;  %v907_v30 = vld [vmem:[#allocation13 + $0xf0] sm:$0xff] }
 0x339   :  { %1122 = vst [vmem:[#allocation14 + $0x20] sm:$0xff] %v1008_v29  ;;  %v1011_v33 = vadd.f32 %v1010_v32, %v882_v28 }
 0x33a   :  { %1125 = vst [vmem:[#allocation14 + $0x38] sm:$0xff] %v1019_v31  ;;  %v905_v31 = vld [vmem:[#allocation13 + $0xe0] sm:$0xff] }
 0x33b   :  { %1123 = vst [vmem:[#allocation14 + $0x28] sm:$0xff] %v1011_v33  ;;  %v908_v33 = vld [vmem:[#allocation13 + $0xf8] sm:$0xff] }
 0x33d   :  { %v1404_v36 = vpop.f32.mrb[24].mxu0 }
 0x33e   :  { %v1032_v38 = vadd.f32 %v1404_v36, %v887_v34  ;;  %v1023_v39 = vpop.f32.mrb[25].mxu0  ;;  %v906_v36 = vld [vmem:[#allocation13 + $0xe8] sm:$0xff] }
 0x33f   :  { %v1024_v41 = vadd.f32 %v1023_v39, %v885_v35  ;;  %v1405_v42 = vpop.f32.mrb[26].mxu0 }
 0x340   :  { %1128 = vst [vmem:[#allocation14 + $0x50] sm:$0xff] %v1032_v38  ;;  %v1035_v43 = vadd.f32 %v1405_v42, %v888_v37  ;;  %v1026_v44 = vpop.f32.mrb[27].mxu0 }
 0x341   :  { %1126 = vst [vmem:[#allocation14 + $0x40] sm:$0xff] %v1024_v41  ;;  %v1027_v45 = vadd.f32 %v1026_v44, %v886_v40 }
 0x342   :  { %1129 = vst [vmem:[#allocation14 + $0x58] sm:$0xff] %v1035_v43 }
 0x343   :  { %1127 = vst [vmem:[#allocation14 + $0x48] sm:$0xff] %v1027_v45 }
 0x345   :  { %v1408_v49 = vpop.f32.mrb[28].mxu0 }
 0x346   :  { %v1048_v52 = vadd.f32 %v1408_v49, %v891_v47  ;;  %v1039_v53 = vpop.f32.mrb[29].mxu0 }
 0x347   :  { %v1040_v55 = vadd.f32 %v1039_v53, %v889_v48  ;;  %v1409_v56 = vpop.f32.mrb[30].mxu0 }
 0x348   :  { %1132 = vst [vmem:[#allocation14 + $0x70] sm:$0xff] %v1048_v52  ;;  %v1051_v57 = vadd.f32 %v1409_v56, %v892_v50  ;;  %v1042_v58 = vpop.f32.mrb[31].mxu0 }
 0x349   :  { %1130 = vst [vmem:[#allocation14 + $0x60] sm:$0xff] %v1040_v55  ;;  %v1043_v59 = vadd.f32 %v1042_v58, %v890_v54 }
 0x34a   :  { %1133 = vst [vmem:[#allocation14 + $0x78] sm:$0xff] %v1051_v57 }
 0x34b   :  { %1131 = vst [vmem:[#allocation14 + $0x68] sm:$0xff] %v1043_v59 }
 0x34d   :  { %v1412_v62 = vpop.f32.mrb[32].mxu0 }
 0x34e   :  { %v1064_v63 = vadd.f32 %v1412_v62, %v895_v60  ;;  %v1055_v10 = vpop.f32.mrb[33].mxu0 }
 0x34f   :  { %v1056_v51 = vadd.f32 %v1055_v10, %v893_v61  ;;  %v1413_v1 = vpop.f32.mrb[34].mxu0 }
 0x350   :  { %1136 = vst [vmem:[#allocation14 + $0x90] sm:$0xff] %v1064_v63  ;;  %v1067_v46 = vadd.f32 %v1413_v1, %v896_v15  ;;  %v1058_v2 = vpop.f32.mrb[35].mxu0 }
 0x351   :  { %1134 = vst [vmem:[#allocation14 + $0x80] sm:$0xff] %v1056_v51  ;;  %v1059_v3 = vadd.f32 %v1058_v2, %v894_v0 }
 0x352   :  { %1137 = vst [vmem:[#allocation14 + $0x98] sm:$0xff] %v1067_v46 }
 0x353   :  { %1135 = vst [vmem:[#allocation14 + $0x88] sm:$0xff] %v1059_v3 }
 0x355   :  { %v1416_v6 = vpop.f32.mrb[36].mxu0 }
 0x356   :  { %v1080_v8 = vadd.f32 %v1416_v6, %v899_v4  ;;  %v1071_v9 = vpop.f32.mrb[37].mxu0 }
 0x357   :  { %v1072_v12 = vadd.f32 %v1071_v9, %v897_v5  ;;  %v1417_v13 = vpop.f32.mrb[38].mxu0 }
 0x358   :  { %1140 = vst [vmem:[#allocation14 + $0xb0] sm:$0xff] %v1080_v8  ;;  %v1083_v14 = vadd.f32 %v1417_v13, %v900_v7  ;;  %v1074_v16 = vpop.f32.mrb[39].mxu0 }
 0x359   :  { %1138 = vst [vmem:[#allocation14 + $0xa0] sm:$0xff] %v1072_v12  ;;  %v1075_v17 = vadd.f32 %v1074_v16, %v898_v11 }
 0x35a   :  { %1141 = vst [vmem:[#allocation14 + $0xb8] sm:$0xff] %v1083_v14 }
 0x35b   :  { %1139 = vst [vmem:[#allocation14 + $0xa8] sm:$0xff] %v1075_v17 }
 0x35d   :  { %v1420_v20 = vpop.f32.mrb[40].mxu0 }
 0x35e   :  { %v1096_v22 = vadd.f32 %v1420_v20, %v903_v18  ;;  %v1087_v23 = vpop.f32.mrb[41].mxu0 }
 0x35f   :  { %v1088_v25 = vadd.f32 %v1087_v23, %v901_v19  ;;  %v1421_v26 = vpop.f32.mrb[42].mxu0 }
 0x360   :  { %1144 = vst [vmem:[#allocation14 + $0xd0] sm:$0xff] %v1096_v22  ;;  %v1099_v27 = vadd.f32 %v1421_v26, %v904_v21  ;;  %v1090_v28 = vpop.f32.mrb[43].mxu0 }
 0x361   :  { %1142 = vst [vmem:[#allocation14 + $0xc0] sm:$0xff] %v1088_v25  ;;  %v1091_v29 = vadd.f32 %v1090_v28, %v902_v24 }
 0x362   :  { %1145 = vst [vmem:[#allocation14 + $0xd8] sm:$0xff] %v1099_v27 }
 0x363   :  { %1143 = vst [vmem:[#allocation14 + $0xc8] sm:$0xff] %v1091_v29 }
 0x365   :  { %v1424_v32 = vpop.f32.mrb[44].mxu0 }
 0x366   :  { %v1112_v34 = vadd.f32 %v1424_v32, %v907_v30  ;;  %v1103_v35 = vpop.f32.mrb[45].mxu0 }
 0x367   :  { %v1104_v37 = vadd.f32 %v1103_v35, %v905_v31  ;;  %v1425_v38 = vpop.f32.mrb[46].mxu0 }
 0x368   :  { %1148 = vst [vmem:[#allocation14 + $0xf0] sm:$0xff] %v1112_v34  ;;  %v1115_v39 = vadd.f32 %v1425_v38, %v908_v33  ;;  %v1106_v40 = vpop.f32.mrb[47].mxu0 }
 0x369   :  { %1146 = vst [vmem:[#allocation14 + $0xe0] sm:$0xff] %v1104_v37  ;;  %v1107_v41 = vadd.f32 %v1106_v40, %v906_v36 }
 0x36a   :  { %1149 = vst [vmem:[#allocation14 + $0xf8] sm:$0xff] %v1115_v39 }
 0x36b   :  { %1147 = vst [vmem:[#allocation14 + $0xe8] sm:$0xff] %v1107_v41 }
 0x36c   :  { %1659 = shalt.err (!%p1656_p4)
}
 0x36d   :  { %s1660_s27 = scalar_lea.hbm %s1885_s7, 4096 }
 0x36e   :  { %p1661_p5 = scmp.ne.s32.totalorder %s1885_s7, %s1660_s27  ;;  %p1664_p6 = scmp.lt.u32.totalorder %s1660_s27, %s1885_s7 }
 0x370   :  { %p1666_p7 = pnand %p1664_p6, %p1661_p5 }
 0x372   :  { %1669 = shalt.err (!%p1666_p7)
}
 0x373   :  { %1161 = dma.vmem_to_hbm [thread:$0]  %s1156_s16, 4096, %s1885_s7, [#allocation4], %s1687_s0, %s1687_s0, %s1688_s13  }
 0x374   :  { %1678 = dma.done.wait [#allocation4], 4096  }
 0x375   :  { %1679 = vsyncadd [#allocation4], 4294963200 }
 0x376   :  { %1165 = vsyncpa [#allocation3], 1 }
 0x377   :  { %1166 = vsyncpa [#allocation6], 1 }
 0x378   :  { %1167 = vsyncpa [#allocation9], 1 }
 0x379   :  { %1168 = vsyncpa [#allocation12], 1 }
 0x37a   :  { %1169 = vsyncpa [#allocation4], 1 }

</bundles_post_ra>
